<compile_context>
chip_gen: v7x
topology: tpu7x:2x2x1
jax: 0.10.0
libtpu: 0.0.40
codegen_flags: <defaults>
</compile_context>

<pallas_src>
import functools

import jax
import jax.numpy as jnp
from jax.experimental import pallas as pl
from jax.experimental.pallas import tpu as pltpu


# ----------------------------- glue (plain JAX) -----------------------------

def _round_up(x, m):
    return ((x + m - 1) // m) * m


def adaptive_max_pool2d(x, out_size):
    """PyTorch adaptive_max_pool2d semantics, NCHW input."""
    n, c, h, w = x.shape
    ho, wo = out_size
    if h % ho == 0 and w % wo == 0:
        # evenly-divisible case: a single reduce_window
        sh, sw = h // ho, w // wo
        return jax.lax.reduce_window(
            x, jnp.array(-jnp.inf, dtype=x.dtype), jax.lax.max,
            window_dimensions=(1, 1, sh, sw),
            window_strides=(1, 1, sh, sw),
            padding="VALID")
    # general (uneven windows) fallback, exact PyTorch semantics
    rows = []
    for i in range(ho):
        h0 = (i * h) // ho
        h1 = -((-(i + 1) * h) // ho)
        cols = []
        for j in range(wo):
            w0 = (j * w) // wo
            w1 = -((-(j + 1) * w) // wo)
            cols.append(jnp.max(x[:, :, h0:h1, w0:w1], axis=(2, 3)))
        rows.append(jnp.stack(cols, axis=-1))
    return jnp.stack(rows, axis=-2)


# ------------------------------ Pallas kernels -------------------------------

def _fused_conv_stats_kernel(p_ref, w_ref, b_ref, y_ref, stats_ref, *, nhw, tile):
    """Fused depthwise+pointwise conv (one matmul) + global BN statistics."""
    pid = pl.program_id(0)

    # (O, kh*kw*C) @ (kh*kw*C, TILE) -> (O, TILE); NHW on the lane axis.
    y = jnp.dot(w_ref[...], p_ref[...], preferred_element_type=jnp.float32)
    y = y + b_ref[...]
    y_ref[...] = y

    # One-pass, padding-masked statistics: sum and sum-of-squares per channel.
    col = jax.lax.broadcasted_iota(jnp.int32, y.shape, 1) + pid * tile
    yv = jnp.where(col < nhw, y, 0.0)
    part = jnp.concatenate(
        [jnp.sum(yv, axis=1, keepdims=True),
         jnp.sum(yv * yv, axis=1, keepdims=True)], axis=1)        # (O, 2)

    @pl.when(pid == 0)
    def _():
        stats_ref[...] = jnp.zeros_like(stats_ref)

    stats_ref[...] += part


def _bn_sigmoid_kernel(y_ref, stats_ref, g_ref, beta_ref, o_ref, *, inv_count, eps):
    """Global batch-norm (batch stats, biased var) + affine + sigmoid."""
    mean = stats_ref[:, 0:1] * inv_count
    var = stats_ref[:, 1:2] * inv_count - mean * mean
    scale = g_ref[...] * jax.lax.rsqrt(var + eps)
    shift = beta_ref[...] - mean * scale
    o_ref[...] = jax.nn.sigmoid(y_ref[...] * scale + shift)


# --------------------------------- wrapper -----------------------------------

def attention2d_forward(x, params, size, *, num_kernels, kernel_size, padding):
    n, c, _, _ = x.shape
    hs, ws = size
    kh, kw = kernel_size
    ph, pw = padding
    k = num_kernels
    o = params["b_point"].shape[0]

    # --- glue: adaptive max pool (NCHW) + zero pad + lane-dense im2col -------
    xpool = adaptive_max_pool2d(x, (hs, ws)).astype(jnp.float32)   # (N, C, Hs, Ws)
    xpad = jnp.pad(xpool, ((0, 0), (0, 0), (ph, ph), (pw, pw)))

    taps = [xpad[:, :, dy:dy + hs, dx:dx + ws]                     # (N, C, Hs, Ws)
            for dy in range(kh) for dx in range(kw)]
    patches = jnp.stack(taps, axis=0)                              # (khkw, N, C, Hs, Ws)
    patches = patches.transpose(0, 2, 1, 3, 4).reshape(kh * kw * c, n * hs * ws)

    nhw = n * hs * ws
    tile = min(2048, _round_up(nhw, 128))
    nhw_pad = _round_up(nhw, tile)
    num_tiles = nhw_pad // tile
    patches = jnp.pad(patches, ((0, 0), (0, nhw_pad - nhw)))       # (khkwC, NHW_pad)

    # --- algebraic fusion of depthwise + pointwise conv ----------------------
    # W[o, t*C + c] = sum_k wd[c*K + k, t] * wp[o, c*K + k];  b = bp + wp @ bd
    wd = params["w_depth"][:, 0].reshape(c, k, kh * kw).astype(jnp.float32)   # (C, K, khkw)
    wp = params["w_point"][:, :, 0, 0].astype(jnp.float32)                    # (O, C*K)
    w_comb = jnp.einsum("ckt,ock->otc", wd, wp.reshape(o, c, k))
    w_comb = w_comb.reshape(o, kh * kw * c)                                   # (O, khkwC)
    b_comb = (params["b_point"].astype(jnp.float32)
              + wp @ params["b_depth"].astype(jnp.float32)).reshape(o, 1)
    gamma = params["gamma"].astype(jnp.float32).reshape(o, 1)
    beta = params["beta"].astype(jnp.float32).reshape(o, 1)

    # --- pass 1: fused conv matmul + global BN statistics (accumulator) ------
    y_pre, stats = pl.pallas_call(
        functools.partial(_fused_conv_stats_kernel, nhw=nhw, tile=tile),
        grid=(num_tiles,),
        in_specs=[pl.BlockSpec((kh * kw * c, tile), lambda i: (0, i)),
                  pl.BlockSpec((o, kh * kw * c), lambda i: (0, 0)),
                  pl.BlockSpec((o, 1), lambda i: (0, 0))],
        out_specs=(pl.BlockSpec((o, tile), lambda i: (0, i)),
                   pl.BlockSpec((o, 2), lambda i: (0, 0))),
        out_shape=(jax.ShapeDtypeStruct((o, nhw_pad), jnp.float32),
                   jax.ShapeDtypeStruct((o, 2), jnp.float32)),
        compiler_params=pltpu.CompilerParams(
            dimension_semantics=("arbitrary",)),
    )(patches, w_comb, b_comb)

    # --- pass 2: normalize with global batch stats + sigmoid (parallel) ------
    out_flat = pl.pallas_call(
        functools.partial(_bn_sigmoid_kernel, inv_count=1.0 / nhw, eps=1e-5),
        grid=(num_tiles,),
        in_specs=[pl.BlockSpec((o, tile), lambda i: (0, i)),
                  pl.BlockSpec((o, 2), lambda i: (0, 0)),
                  pl.BlockSpec((o, 1), lambda i: (0, 0)),
                  pl.BlockSpec((o, 1), lambda i: (0, 0))],
        out_specs=pl.BlockSpec((o, tile), lambda i: (0, i)),
        out_shape=jax.ShapeDtypeStruct((o, nhw_pad), jnp.float32),
        compiler_params=pltpu.CompilerParams(
            dimension_semantics=("parallel",)),
    )(y_pre, stats, gamma, beta)

    out = out_flat[:, :nhw].reshape(o, n, hs, ws).transpose(1, 0, 2, 3)  # (N, O, Hs, Ws)
    if n == 1:
        # EvilBatchNorm2d expands a batch-1 input to batch 2; batch statistics
        # of the duplicated tensor are identical, so the output is duplicated.
        out = jnp.concatenate([out, out], axis=0)
    return out


# --------------------------- pure-JAX reference ------------------------------

def reference_forward(x, params, size, *, in_channels, padding):
    ph, pw = padding
    xp = adaptive_max_pool2d(x, size)
    y = jax.lax.conv_general_dilated(
        xp, params["w_depth"], window_strides=(1, 1),
        padding=((ph, ph), (pw, pw)),
        dimension_numbers=("NCHW", "OIHW", "NCHW"),
        feature_group_count=in_channels)
    y = y + params["b_depth"][None, :, None, None]
    z = jnp.einsum("nchw,oc->nohw", y, params["w_point"][:, :, 0, 0])
    z = z + params["b_point"][None, :, None, None]
    if z.shape[0] == 1:
        z = jnp.concatenate([z, z], axis=0)
    mean = z.mean(axis=(0, 2, 3), keepdims=True)
    var = jnp.square(z - mean).mean(axis=(0, 2, 3), keepdims=True)
    zn = (z - mean) / jnp.sqrt(var + 1e-5)
    zn = zn * params["gamma"][None, :, None, None] + params["beta"][None, :, None, None]
    return jax.nn.sigmoid(zn)


# ----------------------------------- main ------------------------------------

if __name__ == "__main__":
    # Module config (small, consistent with Attention2d.__init__)
    in_channels = 4
    out_channels = 8
    num_kernels = 3
    kernel_size = (3, 3)
    padding_size = (1, 1)
    size = (8, 8)          # adaptive_max_pool2d target size

    key = jax.random.PRNGKey(0)
    kx, k1, k2, k3, k4, k5, k6 = jax.random.split(key, 7)

    x = jax.random.normal(kx, (2, in_channels, 16, 16), dtype=jnp.float32)

    params = {
        # conv_depth: Conv2d(C, C*K, kernel_size, padding, groups=C)
        "w_depth": 0.1 * jax.random.normal(
            k1, (in_channels * num_kernels, 1) + kernel_size, dtype=jnp.float32),
        "b_depth": 0.1 * jax.random.normal(
            k2, (in_channels * num_kernels,), dtype=jnp.float32),
        # conv_point: Conv2d(C*K, O, 1)
        "w_point": 0.1 * jax.random.normal(
            k3, (out_channels, in_channels * num_kernels, 1, 1), dtype=jnp.float32),
        "b_point": 0.1 * jax.random.normal(k4, (out_channels,), dtype=jnp.float32),
        # EvilBatchNorm2d affine params
        "gamma": 1.0 + 0.1 * jax.random.normal(k5, (out_channels,), dtype=jnp.float32),
        "beta": 0.1 * jax.random.normal(k6, (out_channels,), dtype=jnp.float32),
    }

    out = attention2d_forward(
        x, params, size,
        num_kernels=num_kernels, kernel_size=kernel_size, padding=padding_size)
    out = jax.block_until_ready(out)

    ref = reference_forward(
        x, params, size, in_channels=in_channels, padding=padding_size)
    ref = jax.block_until_ready(ref)

    assert out.shape == ref.shape, (out.shape, ref.shape)
    max_err = float(jnp.max(jnp.abs(out - ref)))
    assert max_err < 1e-4, f"max abs error {max_err}"

    print("KERNEL_OK")
</pallas_src>

<mosaic_0001>
module attributes {stable_mosaic.version = 11 : i64} {
  func.func @_fused_conv_stats_kernel(%arg0: i32, %arg1: memref<36x128xf32, #tpu.memory_space<vmem>>, %arg2: memref<8x36xf32, #tpu.memory_space<vmem>>, %arg3: memref<8x1xf32, #tpu.memory_space<vmem>>, %arg4: memref<8x128xf32, #tpu.memory_space<vmem>>, %arg5: memref<8x2xf32, #tpu.memory_space<vmem>>) attributes {dimension_semantics = [#tpu.dimension_semantics<arbitrary>], iteration_bounds = array<i64: 1>, scalar_prefetch = 0 : i64, scratch_operands = 0 : i64, tpu.core_type = #tpu.core_type<tc>, window_params = [{transform_indices = @transform_0, window_bounds = array<i64: 36, 128>}, {pipeline_mode = #tpu.pipeline_mode<synchronous>, transform_indices = @transform_1, window_bounds = array<i64: 8, 36>}, {pipeline_mode = #tpu.pipeline_mode<synchronous>, transform_indices = @transform_2, window_bounds = array<i64: 8, 1>}, {transform_indices = @transform_3, window_bounds = array<i64: 8, 128>}, {pipeline_mode = #tpu.pipeline_mode<synchronous>, transform_indices = @transform_4, window_bounds = array<i64: 8, 2>}]} {
    %c0 = arith.constant 0 : index
    %c0_0 = arith.constant 0 : index
    %0 = vector.load %arg2[%c0, %c0_0] : memref<8x36xf32, #tpu.memory_space<vmem>>, vector<8x36xf32>
    %c0_1 = arith.constant 0 : index
    %c0_2 = arith.constant 0 : index
    %1 = vector.load %arg1[%c0_1, %c0_2] : memref<36x128xf32, #tpu.memory_space<vmem>>, vector<36x128xf32>
    %cst = arith.constant dense<0.000000e+00> : vector<8x128xf32>
    %2 = tpu.matmul %0, %1, %cst {dimension_numbers = #tpu.dot_dimension_numbers<[1], [0], [0], [1], [0, 0, 1, 1], [], []>} : vector<8x36xf32>, vector<36x128xf32>, vector<8x128xf32> -> vector<8x128xf32>
    %c0_3 = arith.constant 0 : index
    %c0_4 = arith.constant 0 : index
    %3 = vector.load %arg3[%c0_3, %c0_4] : memref<8x1xf32, #tpu.memory_space<vmem>>, vector<8x1xf32>
    %4 = vector.broadcast %3 : vector<8x1xf32> to vector<8x128xf32>
    %5 = arith.addf %2, %4 : vector<8x128xf32>
    %c0_5 = arith.constant 0 : index
    %c0_6 = arith.constant 0 : index
    %6 = vector.load %arg4[%c0_5, %c0_6] : memref<8x128xf32, #tpu.memory_space<vmem>>, vector<8x128xf32>
    tpu.vector_store %arg4[%c0_5, %c0_6], %5 {strides = array<i32>} : memref<8x128xf32, #tpu.memory_space<vmem>>, vector<8x128xf32>,
    %7 = tpu.iota {dimensions = array<i32: 1>} : vector<8x128xi32>
    %c128_i32 = arith.constant 128 : i32
    %8 = arith.muli %arg0, %c128_i32 : i32
    %9 = vector.broadcast %8 : i32 to vector<8x128xi32>
    %10 = arith.addi %7, %9 : vector<8x128xi32>
    %c128_i32_7 = arith.constant 128 : i32
    %11 = vector.broadcast %c128_i32_7 : i32 to vector<8x128xi32>
    %12 = arith.cmpi slt, %10, %11 : vector<8x128xi32>
    %cst_8 = arith.constant 0.000000e+00 : f32
    %13 = vector.broadcast %cst_8 : f32 to vector<8x128xf32>
    %14 = arith.select %12, %5, %13 : vector<8x128xi1>, vector<8x128xf32>
    %cst_9 = arith.constant dense<0.000000e+00> : vector<8xf32>
    %15 = vector.multi_reduction <add>, %14, %cst_9 [1] : vector<8x128xf32> to vector<8xf32>
    %16 = vector.shape_cast %15 : vector<8xf32> to vector<8x1xf32>
    %17 = arith.mulf %14, %14 : vector<8x128xf32>
    %cst_10 = arith.constant dense<0.000000e+00> : vector<8xf32>
    %18 = vector.multi_reduction <add>, %17, %cst_10 [1] : vector<8x128xf32> to vector<8xf32>
    %19 = vector.shape_cast %18 : vector<8xf32> to vector<8x1xf32>
    %20 = tpu.concatenate %16, %19 in 1 : vector<8x1xf32>, vector<8x1xf32> -> vector<8x2xf32>
    %c0_i32 = arith.constant 0 : i32
    %21 = arith.cmpi eq, %arg0, %c0_i32 : i32
    %22 = arith.extui %21 : i1 to i32
    %c0_i32_11 = arith.constant 0 : i32
    %23 = arith.cmpi ne, %22, %c0_i32_11 : i32
    scf.if %23 {
      %cst_16 = arith.constant 0.000000e+00 : f32
      %27 = vector.broadcast %cst_16 : f32 to vector<8x2xf32>
      %c0_17 = arith.constant 0 : index
      %c0_18 = arith.constant 0 : index
      %28 = vector.load %arg5[%c0_17, %c0_18] : memref<8x2xf32, #tpu.memory_space<vmem>>, vector<8x2xf32>
      tpu.vector_store %arg5[%c0_17, %c0_18], %27 {strides = array<i32>} : memref<8x2xf32, #tpu.memory_space<vmem>>, vector<8x2xf32>,
    } else {
    }
    %c0_12 = arith.constant 0 : index
    %c0_13 = arith.constant 0 : index
    %24 = vector.load %arg5[%c0_12, %c0_13] : memref<8x2xf32, #tpu.memory_space<vmem>>, vector<8x2xf32>
    %25 = arith.addf %24, %20 : vector<8x2xf32>
    %c0_14 = arith.constant 0 : index
    %c0_15 = arith.constant 0 : index
    %26 = vector.load %arg5[%c0_14, %c0_15] : memref<8x2xf32, #tpu.memory_space<vmem>>, vector<8x2xf32>
    tpu.vector_store %arg5[%c0_14, %c0_15], %25 {strides = array<i32>} : memref<8x2xf32, #tpu.memory_space<vmem>>, vector<8x2xf32>,
    return
  }
  func.func @transform_0(%arg0: i32) -> (i32, i32) {
    %c0_i32 = arith.constant 0 : i32
    %c0_i32_0 = arith.constant 0 : i32
    return %c0_i32, %arg0 : i32, i32
  }
  func.func @transform_1(%arg0: i32) -> (i32, i32) {
    %c0_i32 = arith.constant 0 : i32
    %c0_i32_0 = arith.constant 0 : i32
    %c0_i32_1 = arith.constant 0 : i32
    return %c0_i32, %c0_i32_0 : i32, i32
  }
  func.func @transform_2(%arg0: i32) -> (i32, i32) {
    %c0_i32 = arith.constant 0 : i32
    %c0_i32_0 = arith.constant 0 : i32
    %c0_i32_1 = arith.constant 0 : i32
    return %c0_i32, %c0_i32_0 : i32, i32
  }
  func.func @transform_3(%arg0: i32) -> (i32, i32) {
    %c0_i32 = arith.constant 0 : i32
    %c0_i32_0 = arith.constant 0 : i32
    return %c0_i32, %arg0 : i32, i32
  }
  func.func @transform_4(%arg0: i32) -> (i32, i32) {
    %c0_i32 = arith.constant 0 : i32
    %c0_i32_0 = arith.constant 0 : i32
    %c0_i32_1 = arith.constant 0 : i32
    return %c0_i32, %c0_i32_0 : i32, i32
  }
}

</mosaic_0001>

<bundles_post_ra>
// kernel: tpu_custom_call.1
= control target key start
LH: loop header
LB: loop body
LE: loop exit
PB: predicated region body
PF: predicated region fallthrough
CT: control target
= control target key end

     0   :  { %10 = vsyncpa [#allocation3], 0  ;;  %s323_s0 = inlined_call_operand.hbm [shape: f32[36,128], index: 0, kind: input, shape index: {}]   ;;  %s324_s1 = inlined_call_operand.vmem [shape: f32[8,36], index: 1, kind: input, shape index: {}]   ;;  %s325_s2 = inlined_call_operand.vmem [shape: f32[8,1], index: 2, kind: input, shape index: {}]   ;;  %s326_s3 = inlined_call_operand.hbm [shape: f32[8,128], index: 3, kind: output, shape index: {0}]   ;;  %s327_s4 = inlined_call_operand.vmem [shape: f32[8,2], index: 4, kind: output, shape index: {1}]  }
   0x1   :  { %11 = vsyncpa [#allocation4], 0  ;;  %s249_s15 = smov [#allocation2]   ;;  %s201_s19 = scalar_lea.hbm %s323_s0, 640 }
   0x2   :  { %s17_s16 = sshll.u32 %s249_s15, 4  ;;  %p202_p0 = scmp.ne.s32.totalorder %s323_s0, %s201_s19  ;;  %s18_s16 = int_to_ptr.vmem [resolvable:$true] %s17_s16 }
   0x3   :  { %p205_p1 = scmp.lt.u32.totalorder %s201_s19, %s323_s0 }
   0x5   :  { %p207_p2 = pnand %p205_p1, %p202_p0 }
   0x7   :  { %210 = shalt.err (!%p207_p2)
}
   0x8   :  { %s211_s24 = scalar_lea.vmem %s18_s16, 640  ;;  %p216_p4 = scmp.lt.s32.totalorder %s18_s16, %s18_s16 }
   0x9   :  { %p212_p3 = scmp.ne.s32.totalorder %s18_s16, %s211_s24  ;;  %p217_p5 = scmp.lt.s32.totalorder %s211_s24, %s211_s24 }
   0xb   :  { %p218_p6 = por %p217_p5, %p216_p4 }
   0xd   :  { %p219_p7 = pnand %p218_p6, %p212_p3 }
   0xf   :  { %222 = shalt.err (!%p219_p7)
}
  0x10   :  { %s250_s25 = smov 128   ;;  %s251_s26 = smov 8  }
  0x11   :  { %23 = dma.hbm_to_vmem [thread:$0]  %s323_s0, 640, %s18_s16, [#allocation3], %s250_s25, %s250_s25, %s251_s26  }
  0x12   :  { %245 = dma.done.wait [#allocation3], 640  }
  0x13   :  { %246 = vsyncadd [#allocation3], 4294966656  ;;  %vm140_vm0 = vcmask 15360   ;;  %v252_v0 = vmov 0.0|0.0   ;;  %v253_v1 = vmov 0.0   ;;  %vm254_vm1 = vmmov 0  }
  0x14   :  { %186 = vmatprep.subr.bf16.mxu0 %v252_v0  ;;  %141 = vst.msk [vmem:[%s327_s4] sm:$0xff] %vm140_vm0, %v253_v1  ;;  %183 = vmatprep.mubr.msk.f32.mxu0 %vm254_vm1, %v253_v1  ;;  %v255_v2 = vmov 0   ;;  %v32_v3 = vld [vmem:[#allocation2] sm:$0xff]  ;;  %v33_v4 = vld [vmem:[#allocation2 + $0x8] sm:$0xff]  ;;  %v34_v5 = vld [vmem:[#allocation2 + $0x10] sm:$0xff]  ;;  %vm47_vm2 = vcmask 1043456  }
  0x15   :  { %200 = vset.pattern.permute.xlu0 %v255_v2  ;;  %v187_v6 = vpack.c.bf16 %v33_v4, %v32_v3  ;;  %v35_v7 = vld [vmem:[#allocation2 + $0x18] sm:$0xff]  ;;  %v37_v8 = vld [vmem:[%s325_s2] sm:$0xff]  ;;  %vm43_vm3 = vcmask 293888   ;;  %s256_s2 = smov [#allocation5]  }
  0x16   :  { %v190_v9 = vpack.c.bf16 %v35_v7, %v34_v5  ;;  %40 = vperm.xlu0 %200, %v37_v8   ;;  %v36_v10 = vld [vmem:[#allocation2 + $0x20] sm:$0xf]  ;;  %s152_s8 = sshll.u32 %s256_s2, 4  ;;  %s153_s8 = int_to_ptr.vmem [resolvable:$true] %s152_s8 }
  0x17   :  { %188 = vmatpush3.bf16.msra.mxu0 %v187_v6  ;;  %v31_v11 = vld [vmem:[%s324_s1] sm:$0xff]  ;;  %s223_s9 = scalar_lea.vmem %s153_s8, 128  ;;  %p228_p9 = scmp.lt.s32.totalorder %s153_s8, %s153_s8 }
  0x18   :  { %189 = vmatprep.subr.bf16.mxu0 %v252_v0  ;;  %p224_p8 = scmp.ne.s32.totalorder %s153_s8, %s223_s9  ;;  %p229_p10 = scmp.lt.s32.totalorder %s223_s9, %s223_s9 }
  0x1a   :  { %p230_p11 = por %p229_p10, %p228_p9 }
  0x1b   :  { %191 = vmatpush3.bf16.msra.mxu0 %v190_v9 }
  0x1c   :  { %181 = vmatprep.subr.mxu0 %v253_v1  ;;  %p231_p12 = pnand %p230_p11, %p224_p8 }
  0x1f   :  { %182 = vmatpush3.msk.msra.mxu0 %vm47_vm2, %v36_v10 }
  0x20   :  { %184 = vmatmul.mubr.msk.f32.vlgmr.msra.gmra.mrb[0].mxu0 %vm43_vm3, %v31_v11 }
  0x95   :  { %v41_v12 = vpop.permute.xlu0 %40 }
  0xf3   :  { %v117_v13 = vpop.f32.mrb[0].mxu0 }
  0xf4   :  { %v118_v14 = vadd.f32 %v117_v13, %v41_v12  ;;  %v185_v15 = vpop.f32.mrb[1].mxu0 }
  0xf6   :  { %121 = vst [vmem:[#allocation5] sm:$0xff] %v118_v14  ;;  %129 = vadd.xlane.f32.xlu0 %v118_v14  ;;  %v131_v16 = vmul.f32 %v118_v14, %v118_v14 }
  0xf8   :  { %132 = vadd.xlane.f32.xlu1 %v131_v16 }
  0xf9   :  { %234 = shalt.err (!%p231_p12)
}
  0xfa   :  { %s235_s11 = scalar_lea.hbm %s326_s3, 128 }
  0xfb   :  { %p236_p13 = scmp.ne.s32.totalorder %s326_s3, %s235_s11  ;;  %p239_p0 = scmp.lt.u32.totalorder %s235_s11, %s326_s3 }
  0xfd   :  { %p241_p1 = pnand %p239_p0, %p236_p13 }
  0xff   :  { %244 = shalt.err (!%p241_p1)
}
 0x100   :  { %155 = dma.vmem_to_hbm [thread:$0]  %s153_s8, 128, %s326_s3, [#allocation4]   ;;  %vm134_vm4 = vcmask 7168   ;;  %v142_v17 = vld [vmem:[%s327_s4] sm:$0xff] }
 0x183   :  { %v130_v18 = vpop.xlane.xlu0 %129 }
 0x185   :  { %v133_v19 = vpop.xlane.xlu1 %132 }
 0x186   :  { %v135_v20 = vsel %vm134_vm4, %v130_v18, %v133_v19 }
 0x187   :  { %v143_v21 = vadd.f32 %v142_v17, %v135_v20 }
 0x189   :  { %145 = vst.msk [vmem:[%s327_s4] sm:$0xff] %vm140_vm0, %v143_v21 }
 0x18a   :  { %247 = dma.done.wait [#allocation4], 128  }
 0x18b   :  { %248 = vsyncadd [#allocation4], 4294967168 }
 0x18c   :  { %163 = vsyncpa [#allocation3], 1 }
 0x18d   :  { %164 = vsyncpa [#allocation4], 1 }

</bundles_post_ra>
